<compile_context>
chip_gen: v5e
topology: v5e:2x2
jax: 0.10.0
libtpu: 0.0.40
codegen_flags: <defaults>
</compile_context>

<pallas_src>
import functools

import jax
import jax.numpy as jnp
from jax.experimental import pallas as pl
from jax.experimental.pallas import tpu as pltpu


def _round_up(n, m):
    return ((n + m - 1) // m) * m


def _vq_body(x_ref, egbd_ref, edist_ref, ee_ref, q_ref, idx_ref, esum_ref, *,
             n_heads, codebook_size):
    # x_ref    : (bt, H*D)  f32   lane-dense input tile
    # egbd_ref : (H*C, H*D) f32   block-diagonal codebook (exact gather / f32 dist)
    # edist_ref: (H*C, H*D)       codebook used by the distance matmul (maybe bf16)
    # ee_ref   : (1, H*C)   f32   per-code squared norms
    # q_ref    : (bt, H*D)  f32   lane-dense quantized output tile
    # idx_ref  : (H, bt)    int32 lane-dense indices (batch on lanes)
    # esum_ref : (H, C, D)  f32   resident emb_sum accumulator (training) or None
    bt, HD = x_ref.shape
    H = n_heads
    C = codebook_size
    D = HD // H

    if esum_ref is not None:
        @pl.when(pl.program_id(1) == 0)
        def _init():
            esum_ref[...] = jnp.zeros_like(esum_ref)

    x = x_ref[...]                                    # (bt, H*D) f32
    xd = x.astype(edist_ref.dtype)                    # one cast per tile

    # Head-fused distance matmul against the block-diagonal codebook:
    #   xe[b, h*C + c] = sum_d x[b, h*D + d] * e[h, c, d]
    xe = jax.lax.dot_general(
        xd, edist_ref[...],
        dimension_numbers=(((1,), (1,)), ((), ())),
        preferred_element_type=jnp.float32)           # (bt, H*C)

    # argmin_c ||x - e_c||^2 == argmin_c (||e_c||^2 - 2 x.e_c); ||x||^2 dropped.
    score = ee_ref[...] - 2.0 * xe                    # (bt, H*C)

    # TODO(synk): for very large codebooks (H*C >~ 4k) tile C with a running
    # (min, argmin) instead of materializing the full (bt, H*C) score / onehot
    # and the H*C x H*D block-diagonal codebook.
    ind_rows = []
    oh_heads = []
    for h in range(H):                                # H is small: static unroll
        s_h = score[:, h * C:(h + 1) * C]             # (bt, C) static lane slice
        ind_h = jnp.argmin(s_h, axis=-1).astype(jnp.int32)           # (bt,)
        ind_rows.append(ind_h[None, :])                               # (1, bt)
        oh_heads.append(
            (jax.lax.broadcasted_iota(jnp.int32, (bt, C), 1)
             == ind_h[:, None]).astype(jnp.float32))                  # (bt, C)

    idx_ref[...] = jnp.concatenate(ind_rows, axis=0)  # (H, bt): one dense store

    # Head-fused exact codebook gather (f32, block-diagonal structure):
    #   q[b, h*D + d] = e[h, argmin_h(b), d]  -> unmasked lane-dense (bt, H*D).
    onehot = jnp.concatenate(oh_heads, axis=1)        # (bt, H*C) f32
    q_ref[...] = jnp.dot(onehot, egbd_ref[...],
                         preferred_element_type=jnp.float32).astype(q_ref.dtype)

    if esum_ref is not None:
        # emb_sum[h, c, d] += sum_b onehot[b, h, c] * x[b, h, d]
        for h in range(H):
            part = jax.lax.dot_general(
                oh_heads[h], x[:, h * D:(h + 1) * D],
                dimension_numbers=(((0,), (0,)), ((), ())),
                preferred_element_type=jnp.float32)   # (C, D)
            esum_ref[h:h + 1, :, :] += part[None, :, :]


def _make_kernel(n_heads, codebook_size, compute_esum, distance_bf16):
    def kernel(*refs):
        it = iter(refs)
        x_ref = next(it)
        egbd_ref = next(it)
        edist_ref = next(it) if distance_bf16 else egbd_ref
        ee_ref = next(it)
        q_ref = next(it)
        idx_ref = next(it)
        esum_ref = next(it) if compute_esum else None
        _vq_body(x_ref, egbd_ref, edist_ref, ee_ref, q_ref, idx_ref, esum_ref,
                 n_heads=n_heads, codebook_size=codebook_size)
    return kernel


def _vmem_limit_bytes():
    """Generation-aware VMEM limit: ~75% of physical VMEM, capped at 100 MiB."""
    cap = 64 * 1024 * 1024                 # conservative fallback (v7x per-core)
    try:
        info = pltpu.get_tpu_info()
        v = getattr(info, "vmem_capacity_bytes", None)
        if v:
            cap = int(v)
    except Exception:
        pass
    return min((cap * 3) // 4, 100 * 1024 * 1024)


def _pick_block_b(B, H, C, D, budget_bytes, key_optim, distance_bf16):
    """Largest batch tile whose layout-aware VMEM working set fits the budget.

    Only returns B itself or a 128-aligned divisor of B so every BlockSpec
    satisfies the (8, 128) block-shape constraints (x/q sublanes, idx lanes)."""
    HD, HC = H * D, H * C
    lane = lambda n: max(_round_up(n, 128), 128)
    sub = lambda n: max(_round_up(n, 8), 8)

    # Grid-invariant blocks (constant index map -> still double-buffered).
    fixed = 2 * sub(HC) * lane(HD) * 4               # f32 block-diag codebook
    if distance_bf16:
        fixed += 2 * sub(HC) * lane(HD) * 2          # bf16 copy for the distance
    fixed += 2 * sub(1) * lane(HC) * 4               # ||e||^2 row
    if key_optim:
        fixed += 2 * H * sub(C) * lane(D) * 4        # resident emb_sum block

    def per_tile(bt):
        v = 2 * sub(bt) * lane(HD) * 4               # x tile (double buffered)
        v += 2 * sub(bt) * lane(HD) * 4              # q tile
        v += 2 * sub(H) * lane(bt) * 4               # index tile
        v += 4 * sub(bt) * lane(HC) * 4              # xe / score / onehot live set
        if distance_bf16:
            v += sub(bt) * lane(HD) * 2              # bf16 copy of the x tile
        return v

    cap = 2048
    while cap > 128 and fixed + per_tile(cap) > budget_bytes:
        cap //= 2
    if B <= cap:
        return B
    for bt in range(cap, 127, -128):                 # cap is a multiple of 128
        if B % bt == 0:
            return bt
    # TODO(synk): masked ragged remainder tile instead of one full-batch tile.
    return B


@functools.partial(jax.jit, static_argnames=("n_heads", "key_optim", "decay",
                                             "distance_bf16", "block_b"))
def vector_quantize(x, key_embed, *, n_heads, key_optim=False, decay=0.99,
                    distance_bf16=False, block_b=None):
    """Pallas implementation of VectorQuantize.forward.

    x:          (B, n_heads * heads_dim) float
    key_embed:  (n_heads, codebook_size, heads_dim) float
    Returns (quantized (B, 1, n_heads*heads_dim),
             emb_ind   (B, n_heads) int32,
             new_key_embed (== key_embed unless key_optim)).
    """
    x = x.astype(jnp.float32)
    key_embed = key_embed.astype(jnp.float32)
    B, HD = x.shape
    H, C, D = key_embed.shape
    assert HD == H * D and H == n_heads

    # ---- grid-invariant precompute, hoisted out of the kernel ---------------
    # Block-diagonal codebook: egbd[h*C + c, g*D + d] = e[h, c, d] * (h == g).
    # One f32 copy feeds both the head-fused distance matmul and the exact
    # one-hot gather; an optional bf16 copy feeds the distance matmul only.
    eye = jnp.eye(H, dtype=jnp.float32)
    egbd = jnp.einsum("hcd,hg->hcgd", key_embed, eye).reshape(H * C, H * D)
    ee = jnp.sum(key_embed * key_embed, axis=-1).reshape(1, H * C)   # ||e_c||^2

    vmem_limit = _vmem_limit_bytes()
    budget = max(vmem_limit - 6 * 1024 * 1024, 8 * 1024 * 1024)
    if block_b is None:
        bt = _pick_block_b(B, H, C, D, budget, key_optim, distance_bf16)
    else:
        bt = block_b
        assert B % bt == 0 and (bt == B or bt % 128 == 0)
    num_bt = B // bt

    # v7x megacore: the batch-tile axis must run serially in training (emb_sum
    # accumulation), so split it into (parallel splits) x (serial steps) and emit
    # one partial emb_sum per split; the wrapper sums the partials.
    n_splits = 2 if (key_optim and num_bt >= 2 and num_bt % 2 == 0) else 1
    steps = num_bt // n_splits

    x_map = lambda s, b: (s * steps + b, 0)
    const_map = lambda s, b: (0, 0)
    idx_map = lambda s, b: (0, s * steps + b)

    # NOTE: the codebook / ee blocks have a constant index map; default
    # double-buffering of them is accounted for in _pick_block_b.
    in_specs = [pl.BlockSpec((bt, HD), x_map),
                pl.BlockSpec((H * C, HD), const_map)]
    inputs = [x, egbd]
    if distance_bf16:
        in_specs.append(pl.BlockSpec((H * C, HD), const_map))
        inputs.append(egbd.astype(jnp.bfloat16))
    in_specs.append(pl.BlockSpec((1, H * C), const_map))
    inputs.append(ee)

    out_shape = [jax.ShapeDtypeStruct((B, HD), jnp.float32),
                 jax.ShapeDtypeStruct((H, B), jnp.int32)]
    out_specs = [pl.BlockSpec((bt, HD), x_map),
                 pl.BlockSpec((H, bt), idx_map)]
    if key_optim:
        # Per-split resident accumulator (constant block index along the inner
        # "arbitrary" axis).
        out_shape.append(jax.ShapeDtypeStruct((n_splits, H, C, D), jnp.float32))
        out_specs.append(pl.BlockSpec((None, H, C, D), lambda s, b: (s, 0, 0, 0)))

    grid_spec = pltpu.PrefetchScalarGridSpec(
        num_scalar_prefetch=0,
        grid=(n_splits, steps),
        in_specs=in_specs,
        out_specs=out_specs)

    outs = pl.pallas_call(
        _make_kernel(H, C, key_optim, distance_bf16),
        out_shape=tuple(out_shape),
        grid_spec=grid_spec,
        compiler_params=pltpu.CompilerParams(
            dimension_semantics=("parallel",
                                 "arbitrary" if key_optim else "parallel"),
            vmem_limit_bytes=vmem_limit),
    )(*inputs)

    if key_optim:
        q, idx_hb, esum_parts = outs
        emb_sum = jnp.sum(esum_parts, axis=0)                 # (H, C, D)
        # torch: self.key_embed.data.lerp_(emb_sum, decay)  (literal semantics)
        new_key_embed = key_embed + decay * (emb_sum - key_embed)
    else:
        q, idx_hb = outs
        new_key_embed = key_embed

    quantized = q.reshape(B, 1, HD)                           # free reshape
    emb_ind = idx_hb.T                                        # tiny int32 transpose
    return quantized, emb_ind, new_key_embed


# ----------------------------- test helpers ----------------------------------
def kaiming_uniform_init(key, shape):
    # torch.nn.init.kaiming_uniform_ (a=0): fan_in = shape[1] * prod(shape[2:])
    fan_in = shape[1]
    for s in shape[2:]:
        fan_in *= s
    bound = (6.0 / fan_in) ** 0.5
    return jax.random.uniform(key, shape, jnp.float32, minval=-bound, maxval=bound)


def _reference_from_indices(x, key_embed, emb_ind):
    """Recompute quantized / emb_sum from the kernel's indices (pure jnp)."""
    B = x.shape[0]
    H, C, D = key_embed.shape
    xf = x.reshape(B, H, D)
    onehot = jax.nn.one_hot(emb_ind, C, dtype=jnp.float32)            # (B, H, C)
    quant = jnp.einsum("bhc,hcd->bhd", onehot, key_embed,
                       precision=jax.lax.Precision.HIGHEST)
    emb_sum = jnp.einsum("bhc,bhd->hcd", onehot, xf,
                         precision=jax.lax.Precision.HIGHEST)
    return quant.reshape(B, 1, H * D), emb_sum


def _max_suboptimality(x, key_embed, emb_ind):
    """How far (in squared distance) the chosen codes are from the true argmin."""
    B = x.shape[0]
    H, C, D = key_embed.shape
    xf = x.reshape(B, H, D)
    d2 = (jnp.sum(xf * xf, -1)[:, :, None]
          - 2.0 * jnp.einsum("bhd,hcd->bhc", xf, key_embed,
                             precision=jax.lax.Precision.HIGHEST)
          + jnp.sum(key_embed * key_embed, -1)[None, :, :])           # (B, H, C)
    chosen = jnp.take_along_axis(d2, emb_ind[:, :, None], axis=2)[..., 0]
    return float(jnp.max(chosen - d2.min(axis=2)))


if __name__ == "__main__":
    # Small shapes consistent with the module: hidden = n_heads * heads_dim.
    n_heads = 4
    heads_dim = 32
    codebook_size = 64
    decay_ = 0.99

    key = jax.random.PRNGKey(0)
    ke_key, xk_small, xk_big = jax.random.split(key, 3)
    key_embed = kaiming_uniform_init(ke_key, (n_heads, codebook_size, heads_dim))

    # The second case forces a multi-tile grid and the split (per-core partial
    # emb_sum) training path.
    for batch, blk, xk in [(8, None, xk_small), (512, 128, xk_big)]:
        x = jax.random.normal(xk, (batch, n_heads * heads_dim), jnp.float32)

        # Training path (emb_sum + EMA codebook update).
        quantized, emb_ind, new_key_embed = vector_quantize(
            x, key_embed, n_heads=n_heads, key_optim=True, decay=decay_,
            block_b=blk)
        jax.block_until_ready((quantized, emb_ind, new_key_embed))

        assert quantized.shape == (batch, 1, n_heads * heads_dim)
        assert emb_ind.shape == (batch, n_heads)
        assert new_key_embed.shape == key_embed.shape

        # Consistency checks against a pure-jnp recomputation from the kernel's
        # own indices (robust to argmin tie-breaking), plus near-optimality of
        # the chosen codes.
        q_ref, emb_sum_ref = _reference_from_indices(x, key_embed, emb_ind)
        nke_ref = key_embed + decay_ * (emb_sum_ref - key_embed)
        assert jnp.allclose(quantized, q_ref, atol=1e-3), "quantized mismatch"
        assert jnp.allclose(new_key_embed, nke_ref, atol=1e-2, rtol=1e-2), \
            "EMA codebook update mismatch"
        assert _max_suboptimality(x, key_embed, emb_ind) < 1e-2, "argmin not optimal"

        # Inference path (skips emb_sum matmul / writeback; fully parallel grid).
        q_inf, ind_inf, ke_same = vector_quantize(
            x, key_embed, n_heads=n_heads, key_optim=False, decay=decay_,
            block_b=blk)
        jax.block_until_ready((q_inf, ind_inf, ke_same))
        assert q_inf.shape == quantized.shape and ind_inf.shape == emb_ind.shape
        assert jnp.allclose(ke_same, key_embed), "inference must not update codebook"
        assert _max_suboptimality(x, key_embed, ind_inf) < 1e-2

    print("KERNEL_OK")
</pallas_src>

<mosaic_0001>
module attributes {stable_mosaic.version = 11 : i64} {
  func.func @kernel(%arg0: i32, %arg1: i32, %arg2: memref<8x128xf32, #tpu.memory_space<vmem>>, %arg3: memref<256x128xf32, #tpu.memory_space<vmem>>, %arg4: memref<1x256xf32, #tpu.memory_space<vmem>>, %arg5: memref<8x128xf32, #tpu.memory_space<vmem>>, %arg6: memref<4x8xi32, #tpu.memory_space<vmem>>, %arg7: memref<1x4x64x32xf32, #tpu.memory_space<vmem>>) attributes {dimension_semantics = [#tpu.dimension_semantics<parallel>, #tpu.dimension_semantics<arbitrary>], iteration_bounds = array<i64: 1, 1>, scalar_prefetch = 0 : i64, scratch_operands = 0 : i64, tpu.core_type = #tpu.core_type<tc>, window_params = [{transform_indices = @transform_0, window_bounds = array<i64: 8, 128>}, {pipeline_mode = #tpu.pipeline_mode<synchronous>, transform_indices = @transform_1, window_bounds = array<i64: 256, 128>}, {pipeline_mode = #tpu.pipeline_mode<synchronous>, transform_indices = @transform_2, window_bounds = array<i64: 1, 256>}, {transform_indices = @transform_3, window_bounds = array<i64: 8, 128>}, {transform_indices = @transform_4, window_bounds = array<i64: 4, 8>}, {transform_indices = @transform_5, window_bounds = array<i64: 1, 4, 64, 32>}]} {
    %c0_i32 = arith.constant 0 : i32
    %0 = arith.cmpi eq, %arg1, %c0_i32 : i32
    %1 = arith.extui %0 : i1 to i32
    %c0_i32_0 = arith.constant 0 : i32
    %2 = arith.cmpi ne, %1, %c0_i32_0 : i32
    scf.if %2 {
      %cst_47 = arith.constant 0.000000e+00 : f32
      %89 = vector.broadcast %cst_47 : f32 to vector<4x64x32xf32>
      %c0_48 = arith.constant 0 : index
      %c0_49 = arith.constant 0 : index
      %c0_50 = arith.constant 0 : index
      %c0_51 = arith.constant 0 : index
      %90 = vector.load %arg7[%c0_48, %c0_49, %c0_50, %c0_51] : memref<1x4x64x32xf32, #tpu.memory_space<vmem>>, vector<1x4x64x32xf32>
      %91 = vector.shape_cast %90 : vector<1x4x64x32xf32> to vector<4x64x32xf32>
      %92 = vector.shape_cast %89 : vector<4x64x32xf32> to vector<1x4x64x32xf32>
      tpu.vector_store %arg7[%c0_48, %c0_49, %c0_50, %c0_51], %92 {strides = array<i32>} : memref<1x4x64x32xf32, #tpu.memory_space<vmem>>, vector<1x4x64x32xf32>,
    } else {
    }
    %c0 = arith.constant 0 : index
    %c0_1 = arith.constant 0 : index
    %3 = vector.load %arg2[%c0, %c0_1] : memref<8x128xf32, #tpu.memory_space<vmem>>, vector<8x128xf32>
    %c0_2 = arith.constant 0 : index
    %c0_3 = arith.constant 0 : index
    %4 = vector.load %arg3[%c0_2, %c0_3] : memref<256x128xf32, #tpu.memory_space<vmem>>, vector<256x128xf32>
    %cst = arith.constant dense<0.000000e+00> : vector<8x256xf32>
    %5 = tpu.matmul %3, %4, %cst {dimension_numbers = #tpu.dot_dimension_numbers<[1], [1], [0], [0], [0, 0, 1, 0], [], []>} : vector<8x128xf32>, vector<256x128xf32>, vector<8x256xf32> -> vector<8x256xf32>
    %c0_4 = arith.constant 0 : index
    %c0_5 = arith.constant 0 : index
    %6 = vector.load %arg4[%c0_4, %c0_5] : memref<1x256xf32, #tpu.memory_space<vmem>>, vector<1x256xf32>
    %cst_6 = arith.constant 2.000000e+00 : f32
    %7 = vector.broadcast %cst_6 : f32 to vector<8x256xf32>
    %8 = arith.mulf %7, %5 : vector<8x256xf32>
    %9 = vector.broadcast %6 : vector<1x256xf32> to vector<8x256xf32>
    %10 = arith.subf %9, %8 : vector<8x256xf32>
    %11 = vector.extract_strided_slice %10 {offsets = [0, 0], sizes = [8, 64], strides = [1, 1]} : vector<8x256xf32> to vector<8x64xf32>
    %12 = tpu.reduce_index %11 {axis = 1 : i32, kind = #tpu.reduction_kind<arg_min>} : vector<8x64xf32> -> vector<8xi32>
    %13 = vector.shape_cast %12 : vector<8xi32> to vector<1x8xi32>
    %14 = tpu.iota {dimensions = array<i32: 1>} : vector<8x64xi32>
    %15 = vector.shape_cast %12 : vector<8xi32> to vector<8x1xi32>
    %16 = vector.broadcast %15 : vector<8x1xi32> to vector<8x64xi32>
    %17 = arith.cmpi eq, %14, %16 : vector<8x64xi32>
    %18 = arith.extui %17 : vector<8x64xi1> to vector<8x64xi32>
    %19 = arith.sitofp %18 : vector<8x64xi32> to vector<8x64xf32>
    %20 = vector.extract_strided_slice %10 {offsets = [0, 64], sizes = [8, 64], strides = [1, 1]} : vector<8x256xf32> to vector<8x64xf32>
    %21 = tpu.reduce_index %20 {axis = 1 : i32, kind = #tpu.reduction_kind<arg_min>} : vector<8x64xf32> -> vector<8xi32>
    %22 = vector.shape_cast %21 : vector<8xi32> to vector<1x8xi32>
    %23 = tpu.iota {dimensions = array<i32: 1>} : vector<8x64xi32>
    %24 = vector.shape_cast %21 : vector<8xi32> to vector<8x1xi32>
    %25 = vector.broadcast %24 : vector<8x1xi32> to vector<8x64xi32>
    %26 = arith.cmpi eq, %23, %25 : vector<8x64xi32>
    %27 = arith.extui %26 : vector<8x64xi1> to vector<8x64xi32>
    %28 = arith.sitofp %27 : vector<8x64xi32> to vector<8x64xf32>
    %29 = vector.extract_strided_slice %10 {offsets = [0, 128], sizes = [8, 64], strides = [1, 1]} : vector<8x256xf32> to vector<8x64xf32>
    %30 = tpu.reduce_index %29 {axis = 1 : i32, kind = #tpu.reduction_kind<arg_min>} : vector<8x64xf32> -> vector<8xi32>
    %31 = vector.shape_cast %30 : vector<8xi32> to vector<1x8xi32>
    %32 = tpu.iota {dimensions = array<i32: 1>} : vector<8x64xi32>
    %33 = vector.shape_cast %30 : vector<8xi32> to vector<8x1xi32>
    %34 = vector.broadcast %33 : vector<8x1xi32> to vector<8x64xi32>
    %35 = arith.cmpi eq, %32, %34 : vector<8x64xi32>
    %36 = arith.extui %35 : vector<8x64xi1> to vector<8x64xi32>
    %37 = arith.sitofp %36 : vector<8x64xi32> to vector<8x64xf32>
    %38 = vector.extract_strided_slice %10 {offsets = [0, 192], sizes = [8, 64], strides = [1, 1]} : vector<8x256xf32> to vector<8x64xf32>
    %39 = tpu.reduce_index %38 {axis = 1 : i32, kind = #tpu.reduction_kind<arg_min>} : vector<8x64xf32> -> vector<8xi32>
    %40 = vector.shape_cast %39 : vector<8xi32> to vector<1x8xi32>
    %41 = tpu.iota {dimensions = array<i32: 1>} : vector<8x64xi32>
    %42 = vector.shape_cast %39 : vector<8xi32> to vector<8x1xi32>
    %43 = vector.broadcast %42 : vector<8x1xi32> to vector<8x64xi32>
    %44 = arith.cmpi eq, %41, %43 : vector<8x64xi32>
    %45 = arith.extui %44 : vector<8x64xi1> to vector<8x64xi32>
    %46 = arith.sitofp %45 : vector<8x64xi32> to vector<8x64xf32>
    %47 = tpu.concatenate %13, %22, %31, %40 in 0 : vector<1x8xi32>, vector<1x8xi32>, vector<1x8xi32>, vector<1x8xi32> -> vector<4x8xi32>
    %c0_7 = arith.constant 0 : index
    %c0_8 = arith.constant 0 : index
    %48 = vector.load %arg6[%c0_7, %c0_8] : memref<4x8xi32, #tpu.memory_space<vmem>>, vector<4x8xi32>
    tpu.vector_store %arg6[%c0_7, %c0_8], %47 {strides = array<i32>} : memref<4x8xi32, #tpu.memory_space<vmem>>, vector<4x8xi32>,
    %49 = tpu.concatenate %19, %28, %37, %46 in 1 : vector<8x64xf32>, vector<8x64xf32>, vector<8x64xf32>, vector<8x64xf32> -> vector<8x256xf32>
    %c0_9 = arith.constant 0 : index
    %c0_10 = arith.constant 0 : index
    %50 = vector.load %arg3[%c0_9, %c0_10] : memref<256x128xf32, #tpu.memory_space<vmem>>, vector<256x128xf32>
    %cst_11 = arith.constant dense<0.000000e+00> : vector<8x128xf32>
    %51 = tpu.matmul %49, %50, %cst_11 {dimension_numbers = #tpu.dot_dimension_numbers<[1], [0], [0], [1], [0, 0, 1, 1], [], []>} : vector<8x256xf32>, vector<256x128xf32>, vector<8x128xf32> -> vector<8x128xf32>
    %c0_12 = arith.constant 0 : index
    %c0_13 = arith.constant 0 : index
    %52 = vector.load %arg5[%c0_12, %c0_13] : memref<8x128xf32, #tpu.memory_space<vmem>>, vector<8x128xf32>
    tpu.vector_store %arg5[%c0_12, %c0_13], %51 {strides = array<i32>} : memref<8x128xf32, #tpu.memory_space<vmem>>, vector<8x128xf32>,
    %53 = vector.extract_strided_slice %3 {offsets = [0, 0], sizes = [8, 32], strides = [1, 1]} : vector<8x128xf32> to vector<8x32xf32>
    %cst_14 = arith.constant dense<0.000000e+00> : vector<64x32xf32>
    %54 = tpu.matmul %19, %53, %cst_14 {dimension_numbers = #tpu.dot_dimension_numbers<[0], [0], [1], [1], [0, 1, 1, 1], [], []>} : vector<8x64xf32>, vector<8x32xf32>, vector<64x32xf32> -> vector<64x32xf32>
    %c0_15 = arith.constant 0 : index
    %c0_16 = arith.constant 0 : index
    %c0_17 = arith.constant 0 : index
    %c0_18 = arith.constant 0 : index
    %55 = vector.load %arg7[%c0_15, %c0_16, %c0_17, %c0_18] : memref<1x4x64x32xf32, #tpu.memory_space<vmem>>, vector<1x1x64x32xf32>
    %56 = vector.shape_cast %55 : vector<1x1x64x32xf32> to vector<1x64x32xf32>
    %57 = vector.shape_cast %54 : vector<64x32xf32> to vector<1x64x32xf32>
    %58 = arith.addf %56, %57 : vector<1x64x32xf32>
    %c0_19 = arith.constant 0 : index
    %c0_20 = arith.constant 0 : index
    %c0_21 = arith.constant 0 : index
    %c0_22 = arith.constant 0 : index
    %59 = vector.load %arg7[%c0_19, %c0_20, %c0_21, %c0_22] : memref<1x4x64x32xf32, #tpu.memory_space<vmem>>, vector<1x1x64x32xf32>
    %60 = vector.shape_cast %59 : vector<1x1x64x32xf32> to vector<1x64x32xf32>
    %61 = vector.shape_cast %58 : vector<1x64x32xf32> to vector<1x1x64x32xf32>
    tpu.vector_store %arg7[%c0_19, %c0_20, %c0_21, %c0_22], %61 {strides = array<i32>} : memref<1x4x64x32xf32, #tpu.memory_space<vmem>>, vector<1x1x64x32xf32>,
    %62 = vector.extract_strided_slice %3 {offsets = [0, 32], sizes = [8, 32], strides = [1, 1]} : vector<8x128xf32> to vector<8x32xf32>
    %cst_23 = arith.constant dense<0.000000e+00> : vector<64x32xf32>
    %63 = tpu.matmul %28, %62, %cst_23 {dimension_numbers = #tpu.dot_dimension_numbers<[0], [0], [1], [1], [0, 1, 1, 1], [], []>} : vector<8x64xf32>, vector<8x32xf32>, vector<64x32xf32> -> vector<64x32xf32>
    %c0_24 = arith.constant 0 : index
    %c1 = arith.constant 1 : index
    %c0_25 = arith.constant 0 : index
    %c0_26 = arith.constant 0 : index
    %64 = vector.load %arg7[%c0_24, %c1, %c0_25, %c0_26] : memref<1x4x64x32xf32, #tpu.memory_space<vmem>>, vector<1x1x64x32xf32>
    %65 = vector.shape_cast %64 : vector<1x1x64x32xf32> to vector<1x64x32xf32>
    %66 = vector.shape_cast %63 : vector<64x32xf32> to vector<1x64x32xf32>
    %67 = arith.addf %65, %66 : vector<1x64x32xf32>
    %c0_27 = arith.constant 0 : index
    %c1_28 = arith.constant 1 : index
    %c0_29 = arith.constant 0 : index
    %c0_30 = arith.constant 0 : index
    %68 = vector.load %arg7[%c0_27, %c1_28, %c0_29, %c0_30] : memref<1x4x64x32xf32, #tpu.memory_space<vmem>>, vector<1x1x64x32xf32>
    %69 = vector.shape_cast %68 : vector<1x1x64x32xf32> to vector<1x64x32xf32>
    %70 = vector.shape_cast %67 : vector<1x64x32xf32> to vector<1x1x64x32xf32>
    tpu.vector_store %arg7[%c0_27, %c1_28, %c0_29, %c0_30], %70 {strides = array<i32>} : memref<1x4x64x32xf32, #tpu.memory_space<vmem>>, vector<1x1x64x32xf32>,
    %71 = vector.extract_strided_slice %3 {offsets = [0, 64], sizes = [8, 32], strides = [1, 1]} : vector<8x128xf32> to vector<8x32xf32>
    %cst_31 = arith.constant dense<0.000000e+00> : vector<64x32xf32>
    %72 = tpu.matmul %37, %71, %cst_31 {dimension_numbers = #tpu.dot_dimension_numbers<[0], [0], [1], [1], [0, 1, 1, 1], [], []>} : vector<8x64xf32>, vector<8x32xf32>, vector<64x32xf32> -> vector<64x32xf32>
    %c0_32 = arith.constant 0 : index
    %c2 = arith.constant 2 : index
    %c0_33 = arith.constant 0 : index
    %c0_34 = arith.constant 0 : index
    %73 = vector.load %arg7[%c0_32, %c2, %c0_33, %c0_34] : memref<1x4x64x32xf32, #tpu.memory_space<vmem>>, vector<1x1x64x32xf32>
    %74 = vector.shape_cast %73 : vector<1x1x64x32xf32> to vector<1x64x32xf32>
    %75 = vector.shape_cast %72 : vector<64x32xf32> to vector<1x64x32xf32>
    %76 = arith.addf %74, %75 : vector<1x64x32xf32>
    %c0_35 = arith.constant 0 : index
    %c2_36 = arith.constant 2 : index
    %c0_37 = arith.constant 0 : index
    %c0_38 = arith.constant 0 : index
    %77 = vector.load %arg7[%c0_35, %c2_36, %c0_37, %c0_38] : memref<1x4x64x32xf32, #tpu.memory_space<vmem>>, vector<1x1x64x32xf32>
    %78 = vector.shape_cast %77 : vector<1x1x64x32xf32> to vector<1x64x32xf32>
    %79 = vector.shape_cast %76 : vector<1x64x32xf32> to vector<1x1x64x32xf32>
    tpu.vector_store %arg7[%c0_35, %c2_36, %c0_37, %c0_38], %79 {strides = array<i32>} : memref<1x4x64x32xf32, #tpu.memory_space<vmem>>, vector<1x1x64x32xf32>,
    %80 = vector.extract_strided_slice %3 {offsets = [0, 96], sizes = [8, 32], strides = [1, 1]} : vector<8x128xf32> to vector<8x32xf32>
    %cst_39 = arith.constant dense<0.000000e+00> : vector<64x32xf32>
    %81 = tpu.matmul %46, %80, %cst_39 {dimension_numbers = #tpu.dot_dimension_numbers<[0], [0], [1], [1], [0, 1, 1, 1], [], []>} : vector<8x64xf32>, vector<8x32xf32>, vector<64x32xf32> -> vector<64x32xf32>
    %c0_40 = arith.constant 0 : index
    %c3 = arith.constant 3 : index
    %c0_41 = arith.constant 0 : index
    %c0_42 = arith.constant 0 : index
    %82 = vector.load %arg7[%c0_40, %c3, %c0_41, %c0_42] : memref<1x4x64x32xf32, #tpu.memory_space<vmem>>, vector<1x1x64x32xf32>
    %83 = vector.shape_cast %82 : vector<1x1x64x32xf32> to vector<1x64x32xf32>
    %84 = vector.shape_cast %81 : vector<64x32xf32> to vector<1x64x32xf32>
    %85 = arith.addf %83, %84 : vector<1x64x32xf32>
    %c0_43 = arith.constant 0 : index
    %c3_44 = arith.constant 3 : index
    %c0_45 = arith.constant 0 : index
    %c0_46 = arith.constant 0 : index
    %86 = vector.load %arg7[%c0_43, %c3_44, %c0_45, %c0_46] : memref<1x4x64x32xf32, #tpu.memory_space<vmem>>, vector<1x1x64x32xf32>
    %87 = vector.shape_cast %86 : vector<1x1x64x32xf32> to vector<1x64x32xf32>
    %88 = vector.shape_cast %85 : vector<1x64x32xf32> to vector<1x1x64x32xf32>
    tpu.vector_store %arg7[%c0_43, %c3_44, %c0_45, %c0_46], %88 {strides = array<i32>} : memref<1x4x64x32xf32, #tpu.memory_space<vmem>>, vector<1x1x64x32xf32>,
    return
  }
  func.func @transform_0(%arg0: i32, %arg1: i32) -> (i32, i32) {
    %c1_i32 = arith.constant 1 : i32
    %0 = arith.muli %arg0, %c1_i32 : i32
    %1 = arith.addi %0, %arg1 : i32
    %c0_i32 = arith.constant 0 : i32
    %c0_i32_0 = arith.constant 0 : i32
    return %1, %c0_i32 : i32, i32
  }
  func.func @transform_1(%arg0: i32, %arg1: i32) -> (i32, i32) {
    %c0_i32 = arith.constant 0 : i32
    %c0_i32_0 = arith.constant 0 : i32
    %c0_i32_1 = arith.constant 0 : i32
    return %c0_i32, %c0_i32_0 : i32, i32
  }
  func.func @transform_2(%arg0: i32, %arg1: i32) -> (i32, i32) {
    %c0_i32 = arith.constant 0 : i32
    %c0_i32_0 = arith.constant 0 : i32
    %c0_i32_1 = arith.constant 0 : i32
    return %c0_i32, %c0_i32_0 : i32, i32
  }
  func.func @transform_3(%arg0: i32, %arg1: i32) -> (i32, i32) {
    %c1_i32 = arith.constant 1 : i32
    %0 = arith.muli %arg0, %c1_i32 : i32
    %1 = arith.addi %0, %arg1 : i32
    %c0_i32 = arith.constant 0 : i32
    %c0_i32_0 = arith.constant 0 : i32
    return %1, %c0_i32 : i32, i32
  }
  func.func @transform_4(%arg0: i32, %arg1: i32) -> (i32, i32) {
    %c1_i32 = arith.constant 1 : i32
    %0 = arith.muli %arg0, %c1_i32 : i32
    %1 = arith.addi %0, %arg1 : i32
    %c0_i32 = arith.constant 0 : i32
    %c0_i32_0 = arith.constant 0 : i32
    return %c0_i32, %1 : i32, i32
  }
  func.func @transform_5(%arg0: i32, %arg1: i32) -> (i32, i32, i32, i32) {
    %c0_i32 = arith.constant 0 : i32
    %c0_i32_0 = arith.constant 0 : i32
    %c0_i32_1 = arith.constant 0 : i32
    %c0_i32_2 = arith.constant 0 : i32
    return %arg0, %c0_i32, %c0_i32_0, %c0_i32_1 : i32, i32, i32, i32
  }
}

</mosaic_0001>

<bundles_post_ra>
// kernel: vector_quantize.1
= control target key start
LH: loop header
LB: loop body
LE: loop exit
PB: predicated region body
PF: predicated region fallthrough
CT: control target
= control target key end

     0   :  { %11 = vsyncpa [#allocation3], 0  ;;  %s1650_s0 = inlined_call_operand.vmem [shape: f32[8,128], index: 0, kind: input, shape index: {}]   ;;  %s1651_s1 = inlined_call_operand.vmem [shape: f32[256,128], index: 1, kind: input, shape index: {}]   ;;  %s1652_s2 = inlined_call_operand.vmem [shape: f32[1,256], index: 2, kind: input, shape index: {}]   ;;  %s1653_s3 = inlined_call_operand.hbm [shape: f32[8,128], index: 3, kind: output, shape index: {0}]   ;;  %s1654_s4 = inlined_call_operand.hbm [shape: s32[4,8], index: 4, kind: output, shape index: {1}]   ;;  %s1655_s5 = inlined_call_operand.vmem [shape: f32[1,4,64,32], index: 5, kind: output, shape index: {2}]  }
   0x1   :  { %v91_v0 = vld [vmem:[%s1651_s1 + $0x78] sm:$0xff]  ;;  %v90_v2 = vld [vmem:[%s1651_s1 + $0x70] sm:$0xff]  ;;  %v89_v4 = vld [vmem:[%s1651_s1 + $0x68] sm:$0xff] }
   0x2   :  { %108 = vmatpush.xpose.msra.mxu0 %v91_v0  ;;  %v107_v1 = vld [vmem:[%s1651_s1 + $0xf8] sm:$0xff]  ;;  %247 = vmatpush.msra.mxu2 %v91_v0  ;;  %v106_v3 = vld [vmem:[%s1651_s1 + $0xf0] sm:$0xff]  ;;  %v105_v5 = vld [vmem:[%s1651_s1 + $0xe8] sm:$0xff] }
   0x3   :  { %128 = vmatpush.xpose.msra.mxu1 %v107_v1  ;;  %267 = vmatpush.msra.mxu3 %v107_v1  ;;  %v88_v6 = vld [vmem:[%s1651_s1 + $0x60] sm:$0xff] }
   0x4   :  { %248 = vmatpush.msra.mxu2 %v90_v2 }
   0x5   :  { %268 = vmatpush.msra.mxu3 %v106_v3 }
   0x6   :  { %109 = vmatpush.xpose.msra.mxu0 %v90_v2  ;;  %249 = vmatpush.msra.mxu2 %v89_v4 }
   0x7   :  { %129 = vmatpush.xpose.msra.mxu1 %v106_v3  ;;  %269 = vmatpush.msra.mxu3 %v105_v5 }
   0x8   :  { %12 = vsyncpa [#allocation5], 0  ;;  %v104_v7 = vld [vmem:[%s1651_s1 + $0xe0] sm:$0xff]  ;;  %250 = vmatpush.msra.mxu2 %v88_v6  ;;  %v87_v8 = vld [vmem:[%s1651_s1 + $0x58] sm:$0xff]  ;;  %vm158_vm0 = vcmask 523264   ;;  %s1068_s9 = smov 64   ;;  %v162_v48 = vlaneseq }
   0x9   :  { %270 = vmatpush.msra.mxu3 %v104_v7  ;;  %v103_v9 = vld [vmem:[%s1651_s1 + $0xd8] sm:$0xff]  ;;  %v86_v10 = vld [vmem:[%s1651_s1 + $0x50] sm:$0xff]  ;;  %v85_v12 = vld [vmem:[%s1651_s1 + $0x48] sm:$0xff]  ;;  %v1070_v52 = vmov 0.0   ;;  %vm197_vm3 = vcmask 1040384   ;;  %vm199_vm4 = vcmask 1041408  }
   0xa   :  { %110 = vmatpush.xpose.msra.mxu0 %v89_v4  ;;  %251 = vmatpush.msra.mxu2 %v87_v8  ;;  %v102_v11 = vld [vmem:[%s1651_s1 + $0xd0] sm:$0xff]  ;;  %v101_v13 = vld [vmem:[%s1651_s1 + $0xc8] sm:$0xff]  ;;  %v84_v14 = vld [vmem:[%s1651_s1 + $0x40] sm:$0xff]  ;;  %v163_v49 = vand.u32 127, %v162_v48  ;;  %vm201_vm5 = vcmask 1042432   ;;  %vm203_vm7 = vcmask 60416  }
   0xb   :  { %130 = vmatpush.xpose.msra.mxu1 %v105_v5  ;;  %271 = vmatpush.msra.mxu3 %v103_v9  ;;  %v100_v15 = vld [vmem:[%s1651_s1 + $0xc0] sm:$0xff]  ;;  %v83_v16 = vld [vmem:[%s1651_s1 + $0x38] sm:$0xff]  ;;  %v82_v18 = vld [vmem:[%s1651_s1 + $0x30] sm:$0xff]  ;;  %s1071_s10 = smov 32   ;;  %vm320_vm9 = vcmask 64512   ;;  %vm42_vm10 = vcmask 261120  }
   0xc   :  { %252 = vmatpush.msra.mxu2 %v86_v10  ;;  %v99_v17 = vld [vmem:[%s1651_s1 + $0xb8] sm:$0xff]  ;;  %v98_v19 = vld [vmem:[%s1651_s1 + $0xb0] sm:$0xff]  ;;  %v81_v20 = vld [vmem:[%s1651_s1 + $0x28] sm:$0xff]  ;;  %43 = vst.msk [vmem:[%s1655_s5] sm:$0xff] %vm42_vm10, %v1070_v52  ;;  %s1072_s23 = smov [#allocation2]   ;;  %s797_s27 = sshll.u32 %s1653_s3, 4  ;;  %s798_s27 = int_to_ptr.hbm [resolvable:$true] %s797_s27 }
   0xd   :  { %272 = vmatpush.msra.mxu3 %v102_v11  ;;  %v97_v21 = vld [vmem:[%s1651_s1 + $0xa8] sm:$0xff]  ;;  %v80_v22 = vld [vmem:[%s1651_s1 + $0x20] sm:$0xff]  ;;  %v79_v24 = vld [vmem:[%s1651_s1 + $0x18] sm:$0xff]  ;;  %44 = vst.msk [vmem:[%s1655_s5 + $0x8] sm:$0xff] %vm42_vm10, %v1070_v52  ;;  %s795_s24 = sshll.u32 %s1072_s23, 4  ;;  %s1073_s28 = smov [#allocation4]   ;;  %s796_s24 = int_to_ptr.vmem [resolvable:$true] %s795_s24 }
   0xe   :  { %111 = vmatpush.xpose.msra.mxu0 %v88_v6  ;;  %253 = vmatpush.msra.mxu2 %v85_v12  ;;  %v96_v23 = vld [vmem:[%s1651_s1 + $0xa0] sm:$0xff]  ;;  %v95_v25 = vld [vmem:[%s1651_s1 + $0x98] sm:$0xff]  ;;  %v78_v26 = vld [vmem:[%s1651_s1 + $0x10] sm:$0xff]  ;;  %45 = vst.msk [vmem:[%s1655_s5 + $0x10] sm:$0xff] %vm42_vm10, %v1070_v52  ;;  %s809_s29 = sshll.u32 %s1073_s28, 4  ;;  %s811_s7 = sshll.u32 %s1654_s4, 4  ;;  %s810_s29 = int_to_ptr.vmem [resolvable:$true] %s809_s29  ;;  %s812_s7 = int_to_ptr.hbm [resolvable:$true] %s811_s7 }
   0xf   :  { %131 = vmatpush.xpose.msra.mxu1 %v104_v7  ;;  %273 = vmatpush.msra.mxu3 %v101_v13  ;;  %v94_v27 = vld [vmem:[%s1651_s1 + $0x90] sm:$0xff]  ;;  %v77_v28 = vld [vmem:[%s1651_s1 + $0x8] sm:$0xff]  ;;  %v76_v29 = vld [vmem:[%s1651_s1] sm:$0xff]  ;;  %46 = vst.msk [vmem:[%s1655_s5 + $0x18] sm:$0xff] %vm42_vm10, %v1070_v52 }
  0x10   :  { %254 = vmatpush.msra.mxu2 %v84_v14  ;;  %v93_v30 = vld [vmem:[%s1651_s1 + $0x88] sm:$0xff]  ;;  %v1200_v31 = vld [vmem:[%s1650_s0] sm:$0xff]  ;;  %47 = vst.msk [vmem:[%s1655_s5 + $0x20] sm:$0xff] %vm42_vm10, %v1070_v52 }
  0x11   :  { %274 = vmatpush.msra.mxu3 %v100_v15  ;;  %v92_v32 = vld [vmem:[%s1651_s1 + $0x80] sm:$0xff]  ;;  %48 = vst.msk [vmem:[%s1655_s5 + $0x28] sm:$0xff] %vm42_vm10, %v1070_v52 }
  0x12   :  { %112 = vmatpush.xpose.msra.mxu0 %v87_v8  ;;  %255 = vmatpush.msra.mxu2 %v83_v16  ;;  %v148_v33 = vld [vmem:[%s1652_s2] sm:$0x3]  ;;  %s1069_s2 = smov 96   ;;  %49 = vst.msk [vmem:[%s1655_s5 + $0x30] sm:$0xff] %vm42_vm10, %v1070_v52 }
  0x13   :  { %132 = vmatpush.xpose.msra.mxu1 %v103_v9  ;;  %275 = vmatpush.msra.mxu3 %v99_v17  ;;  %v152_v34 = vperm.slane %v148_v33, 0  ;;  %v153_v40 = vperm.slane %v148_v33, 1  ;;  %50 = vst.msk [vmem:[%s1655_s5 + $0x38] sm:$0xff] %vm42_vm10, %v1070_v52 }
  0x14   :  { %256 = vmatpush.msra.mxu2 %v82_v18  ;;  %51 = vst.msk [vmem:[%s1655_s5 + $0x40] sm:$0xff] %vm42_vm10, %v1070_v52 }
  0x15   :  { %276 = vmatpush.msra.mxu3 %v98_v19  ;;  %52 = vst.msk [vmem:[%s1655_s5 + $0x48] sm:$0xff] %vm42_vm10, %v1070_v52 }
  0x16   :  { %113 = vmatpush.xpose.msra.mxu0 %v86_v10  ;;  %257 = vmatpush.msra.mxu2 %v81_v20  ;;  %53 = vst.msk [vmem:[%s1655_s5 + $0x50] sm:$0xff] %vm42_vm10, %v1070_v52 }
  0x17   :  { %133 = vmatpush.xpose.msra.mxu1 %v102_v11  ;;  %277 = vmatpush.msra.mxu3 %v97_v21  ;;  %54 = vst.msk [vmem:[%s1655_s5 + $0x58] sm:$0xff] %vm42_vm10, %v1070_v52 }
  0x18   :  { %258 = vmatpush.msra.mxu2 %v80_v22  ;;  %55 = vst.msk [vmem:[%s1655_s5 + $0x60] sm:$0xff] %vm42_vm10, %v1070_v52 }
  0x19   :  { %278 = vmatpush.msra.mxu3 %v96_v23  ;;  %56 = vst.msk [vmem:[%s1655_s5 + $0x68] sm:$0xff] %vm42_vm10, %v1070_v52 }
  0x1a   :  { %114 = vmatpush.xpose.msra.mxu0 %v85_v12  ;;  %259 = vmatpush.msra.mxu2 %v79_v24  ;;  %57 = vst.msk [vmem:[%s1655_s5 + $0x70] sm:$0xff] %vm42_vm10, %v1070_v52 }
  0x1b   :  { %134 = vmatpush.xpose.msra.mxu1 %v101_v13  ;;  %279 = vmatpush.msra.mxu3 %v95_v25  ;;  %58 = vst.msk [vmem:[%s1655_s5 + $0x78] sm:$0xff] %vm42_vm10, %v1070_v52 }
  0x1c   :  { %260 = vmatpush.msra.mxu2 %v78_v26  ;;  %59 = vst.msk [vmem:[%s1655_s5 + $0x80] sm:$0xff] %vm42_vm10, %v1070_v52 }
  0x1d   :  { %280 = vmatpush.msra.mxu3 %v94_v27  ;;  %60 = vst.msk [vmem:[%s1655_s5 + $0x88] sm:$0xff] %vm42_vm10, %v1070_v52 }
  0x1e   :  { %115 = vmatpush.xpose.msra.mxu0 %v84_v14  ;;  %261 = vmatpush.msra.mxu2 %v77_v28  ;;  %61 = vst.msk [vmem:[%s1655_s5 + $0x90] sm:$0xff] %vm42_vm10, %v1070_v52 }
  0x1f   :  { %135 = vmatpush.xpose.msra.mxu1 %v100_v15  ;;  %281 = vmatpush.msra.mxu3 %v93_v30  ;;  %62 = vst.msk [vmem:[%s1655_s5 + $0x98] sm:$0xff] %vm42_vm10, %v1070_v52 }
  0x20   :  { %262 = vmatpush.msra.mxu2 %v76_v29  ;;  %63 = vst.msk [vmem:[%s1655_s5 + $0xa0] sm:$0xff] %vm42_vm10, %v1070_v52 }
  0x21   :  { %282 = vmatpush.msra.mxu3 %v92_v32  ;;  %64 = vst.msk [vmem:[%s1655_s5 + $0xa8] sm:$0xff] %vm42_vm10, %v1070_v52 }
  0x22   :  { %116 = vmatpush.xpose.msra.mxu0 %v83_v16  ;;  %360 = vmatpush.msrb.mxu2 %v1200_v31  ;;  %65 = vst.msk [vmem:[%s1655_s5 + $0xb0] sm:$0xff] %vm42_vm10, %v1070_v52 }
  0x23   :  { %136 = vmatpush.xpose.msra.mxu1 %v99_v17  ;;  %66 = vst.msk [vmem:[%s1655_s5 + $0xb8] sm:$0xff] %vm42_vm10, %v1070_v52 }
  0x24   :  { %67 = vst.msk [vmem:[%s1655_s5 + $0xc0] sm:$0xff] %vm42_vm10, %v1070_v52 }
  0x25   :  { %68 = vst.msk [vmem:[%s1655_s5 + $0xc8] sm:$0xff] %vm42_vm10, %v1070_v52 }
  0x26   :  { %117 = vmatpush.xpose.msra.mxu0 %v82_v18  ;;  %69 = vst.msk [vmem:[%s1655_s5 + $0xd0] sm:$0xff] %vm42_vm10, %v1070_v52 }
  0x27   :  { %137 = vmatpush.xpose.msra.mxu1 %v98_v19  ;;  %70 = vst.msk [vmem:[%s1655_s5 + $0xd8] sm:$0xff] %vm42_vm10, %v1070_v52 }
  0x28   :  { %71 = vst.msk [vmem:[%s1655_s5 + $0xe0] sm:$0xff] %vm42_vm10, %v1070_v52 }
  0x29   :  { %72 = vst.msk [vmem:[%s1655_s5 + $0xe8] sm:$0xff] %vm42_vm10, %v1070_v52 }
  0x2a   :  { %118 = vmatpush.xpose.msra.mxu0 %v81_v20  ;;  %73 = vst.msk [vmem:[%s1655_s5 + $0xf0] sm:$0xff] %vm42_vm10, %v1070_v52 }
  0x2b   :  { %138 = vmatpush.xpose.msra.mxu1 %v97_v21  ;;  %74 = vst.msk [vmem:[%s1655_s5 + $0xf8] sm:$0xff] %vm42_vm10, %v1070_v52 }
  0x2e   :  { %119 = vmatpush.xpose.msra.mxu0 %v80_v22 }
  0x2f   :  { %139 = vmatpush.xpose.msra.mxu1 %v96_v23 }
  0x32   :  { %120 = vmatpush.xpose.msra.mxu0 %v79_v24 }
  0x33   :  { %140 = vmatpush.xpose.msra.mxu1 %v95_v25 }
  0x36   :  { %121 = vmatpush.xpose.msra.mxu0 %v78_v26 }
  0x37   :  { %141 = vmatpush.xpose.msra.mxu1 %v94_v27 }
  0x3a   :  { %122 = vmatpush.xpose.msra.mxu0 %v77_v28 }
  0x3b   :  { %142 = vmatpush.xpose.msra.mxu1 %v93_v30 }
  0x3e   :  { %123 = vmatpush.xpose.msra.mxu0 %v76_v29 }
  0x3f   :  { %143 = vmatpush.xpose.msra.mxu1 %v92_v32 }
  0x41   :  { %124 = vmatmul.f32.vlgmr.msra.gmra.mxu0 %v1200_v31 }
  0x42   :  { %144 = vmatmul.f32.vlgmr.msra.gmra.mxu1 %v1200_v31 }
  0xbe   :  { %v125_v35 = vpop.f32.mrf.mxu0 }
  0xbf   :  { %v149_v36 = vmul.f32 2.0, %v125_v35  ;;  %v145_v37 = vpop.f32.mrf.mxu1 }
  0xc0   :  { %v150_v39 = vmul.f32 2.0, %v145_v37 }
  0xc1   :  { %v156_v38 = vsub.f32 %v152_v34, %v149_v36 }
  0xc2   :  { %v157_v42 = vsub.f32 %v153_v40, %v150_v39 }
  0xc3   :  { %168 = vrot.lane.b32.xlu0 %v156_v38, %s1068_s9  ;;  %v159_v41 = vsel %vm158_vm0, %v156_v38, inf }
  0xc4   :  { %160 = vmin.index.xlane.f32.xlu2 %v159_v41  ;;  %v177_v43 = vsel %vm158_vm0, %v157_v42, inf }
  0xcb   :  { %184 = vrot.lane.b32.xlu0 %v157_v42, %s1068_s9 }
  0xcc   :  { %178 = vmin.index.xlane.f32.xlu2 %v177_v43 }
 0x135   :  { %v169_v44 = vpop.permute.xlu0 %168 }
 0x136   :  { %v171_v45 = vsel %vm158_vm0, %v169_v44, inf }
 0x137   :  { %172 = vmin.index.xlane.f32.xlu1 %v171_v45  ;;  %v161_v50 = vpop.xlane.xlu2 %160 }
 0x138   :  { %vm164_vm1 = vcmp.eq.s32.totalorder %v163_v49, %v161_v50  ;;  %v193_v57 = vperm.slane %v161_v50, %v163_v49 }
 0x139   :  { %v835_v53 = vsel %vm164_vm1, 1.0, %v1070_v52 }
 0x13d   :  { %v185_v46 = vpop.permute.xlu0 %184 }
 0x13e   :  { %v187_v47 = vsel %vm158_vm0, %v185_v46, inf }
 0x13f   :  { %188 = vmin.index.xlane.f32.xlu1 %v187_v47  ;;  %v179_v58 = vpop.xlane.xlu2 %178 }
 0x140   :  { %v195_v60 = vperm.slane %v179_v58, %v163_v49  ;;  %vm180_vm8 = vcmp.eq.s32.totalorder %v163_v49, %v179_v58 }
 0x141   :  { %v837_v3 = vsel %vm180_vm8, 1.0, %v1070_v52 }
 0x158   :  { %444 = vrot.lane.b32.xlu1 %v1200_v31, %s1069_s2 }
 0x1aa   :  { %v173_v51 = vpop.xlane.xlu1 %172 }
 0x1ab   :  { %vm174_vm2 = vcmp.eq.s32.totalorder %v163_v49, %v173_v51  ;;  %v194_v55 = vperm.slane %v173_v51, %v163_v49 }
 0x1ac   :  { %v836_v54 = vsel %vm174_vm2, 1.0, %v1070_v52 }
 0x1ad   :  { %v932_v56 = vpack.i.bf16 %v836_v54, %v835_v53  ;;  %v198_v59 = vsel %vm197_vm3, %v193_v57, %v194_v55 }
 0x1ae   :  { %v200_v0 = vsel %vm199_vm4, %v198_v59, %v195_v60 }
 0x1af   :  { %933 = vxpose.xlu2.b32.start.end [1/1] (short) (narrow) %v932_v56, 64 }
 0x1b2   :  { %v189_v61 = vpop.xlane.xlu1 %188 }
 0x1b3   :  { %vm190_vm6 = vcmp.eq.s32.totalorder %v163_v49, %v189_v61  ;;  %v196_v62 = vperm.slane %v189_v61, %v163_v49 }
 0x1b4   :  { %v838_v63 = vsel %vm190_vm6, 1.0, %v1070_v52 }
 0x1b5   :  { %v927_v1 = vpack.i.bf16 %v838_v63, %v836_v54  ;;  %v202_v2 = vsel %vm201_vm5, %v200_v0, %v196_v62  ;;  %v974_v4 = vpack.i.bf16 %v838_v63, %v837_v3 }
 0x1b6   :  { %204 = vst.msk [vmem:[#allocation4] sm:$0xf] %vm203_vm7, %v202_v2  ;;  %v855_v2 = vld [vmem:[%s1655_s5 + $0x40] sm:$0xff] }
 0x1b7   :  { %928 = vrot.lane.b32.xlu0 %v927_v1, %s1068_s9  ;;  %v386_v1 = vld [vmem:[%s1655_s5] sm:$0xff]  ;;  %814 = dma.vmem_to_hbm [thread:$0]  %s810_s29, 64, %s812_s7, [#allocation5]  }
 0x1bf   :  { %569 = vrot.lane.b32.xlu0 %v1200_v31, %s1068_s9 }
 0x1c7   :  { %694 = vrot.lane.b32.xlu0 %v1200_v31, %s1071_s10 }
 0x1ca   :  { %v445_v5 = vpop.permute.xlu1 %444 }
 0x1cb   :  { %486 = vmatpush.msrb.mxu3 %v445_v5 }
 0x1e9   :  { %975 = vxpose.xlu0.b32.start.end [1/1] (short) (narrow) %v974_v4, 64 }
 0x229   :  { %v929_v6 = vpop.permute.xlu0 %928 }
 0x22a   :  { %v931_v7 = vunpack.i.h.bf16 %v929_v6  ;;  %v930_v8 = vunpack.i.l.bf16 %v929_v6  ;;  %v387_v6 = vld [vmem:[%s1655_s5 + $0x8] sm:$0xff] }
 0x22c   :  { %v213_v9 = vsel %vm158_vm0, %v835_v53, %v930_v8  ;;  %v214_v10 = vsel %vm158_vm0, %v837_v3, %v931_v7  ;;  %v856_v7 = vld [vmem:[%s1655_s5 + $0x48] sm:$0xff] }
 0x22d   :  { %263 = vmatmul.f32.vlgmr.msra.gmra.mxu2 %v213_v9  ;;  %283 = vmatmul.f32.vlgmr.msra.gmra.mxu3 %v214_v10 }
 0x231   :  { %v570_v11 = vpop.permute.xlu0 %569 }
 0x232   :  { %611 = vmatpush.msrb.mxu0 %v570_v11  ;;  %919 = vmatpush.msra.mxu2 %v570_v11 }
 0x239   :  { %v695_v12 = vpop.permute.xlu0 %694 }
 0x23a   :  { %736 = vmatpush.msrb.mxu1 %v695_v12  ;;  %920 = vmatpush.msra.mxu3 %v695_v12  ;;  %v388_v12 = vld [vmem:[%s1655_s5 + $0x10] sm:$0xff] }
 0x248   :  { %v934_v13 = vpop.trf.xlu2 }
 0x249   :  { %v938_v14 = vunpack.i.h.bf16 %v934_v13  ;;  %v935_v15 = vunpack.i.l.bf16 %v934_v13  ;;  %v857_v13 = vld [vmem:[%s1655_s5 + $0x50] sm:$0xff] }
 0x24b   :  { %839 = vmatmul.msk.f32.vlgmr.msrb.gmra.mxu2 %vm320_vm9, %v935_v15  ;;  %847 = vmatmul.msk.f32.vlgmr.msrb.gmra.mxu3 %vm320_vm9, %v938_v14 }
 0x250   :  { %v939_v16 = vpop.trf.xlu2 }
 0x251   :  { %v940_v17 = vunpack.i.l.bf16 %v939_v16  ;;  %v943_v18 = vunpack.i.h.bf16 %v939_v16 }
 0x253   :  { %840 = vmatmul.msk.f32.gmra.mxu2 %vm320_vm9, %v940_v17  ;;  %848 = vmatmul.msk.f32.gmra.mxu3 %vm320_vm9, %v943_v18  ;;  %v389_v18 = vld [vmem:[%s1655_s5 + $0x18] sm:$0xff] }
 0x258   :  { %v944_v19 = vpop.trf.xlu2 }
 0x259   :  { %v945_v20 = vunpack.i.l.bf16 %v944_v19  ;;  %v948_v21 = vunpack.i.h.bf16 %v944_v19  ;;  %v858_v19 = vld [vmem:[%s1655_s5 + $0x58] sm:$0xff] }
 0x25b   :  { %841 = vmatmul.msk.f32.gmra.mxu2 %vm320_vm9, %v945_v20  ;;  %849 = vmatmul.msk.f32.gmra.mxu3 %vm320_vm9, %v948_v21 }
 0x260   :  { %v949_v22 = vpop.trf.xlu2 }
 0x261   :  { %v950_v23 = vunpack.i.l.bf16 %v949_v22  ;;  %v953_v24 = vunpack.i.h.bf16 %v949_v22 }
 0x263   :  { %842 = vmatmul.msk.f32.gmra.mxu2 %vm320_vm9, %v950_v23  ;;  %850 = vmatmul.msk.f32.gmra.mxu3 %vm320_vm9, %v953_v24  ;;  %v390_v24 = vld [vmem:[%s1655_s5 + $0x20] sm:$0xff] }
 0x268   :  { %v954_v25 = vpop.trf.xlu2 }
 0x269   :  { %v955_v26 = vunpack.i.l.bf16 %v954_v25  ;;  %v958_v27 = vunpack.i.h.bf16 %v954_v25  ;;  %v859_v25 = vld [vmem:[%s1655_s5 + $0x60] sm:$0xff] }
 0x26b   :  { %843 = vmatmul.msk.f32.gmra.mxu2 %vm320_vm9, %v955_v26  ;;  %851 = vmatmul.msk.f32.gmra.mxu3 %vm320_vm9, %v958_v27 }
 0x270   :  { %v959_v28 = vpop.trf.xlu2 }
 0x271   :  { %v960_v29 = vunpack.i.l.bf16 %v959_v28  ;;  %v963_v30 = vunpack.i.h.bf16 %v959_v28 }
 0x273   :  { %844 = vmatmul.msk.f32.gmra.mxu2 %vm320_vm9, %v960_v29  ;;  %852 = vmatmul.msk.f32.gmra.mxu3 %vm320_vm9, %v963_v30  ;;  %v391_v30 = vld [vmem:[%s1655_s5 + $0x28] sm:$0xff] }
 0x278   :  { %v964_v32 = vpop.trf.xlu2 }
 0x279   :  { %v965_v35 = vunpack.i.l.bf16 %v964_v32  ;;  %v968_v36 = vunpack.i.h.bf16 %v964_v32  ;;  %v879_v32 = vld [vmem:[%s1655_s5 + $0x80] sm:$0xff] }
 0x27b   :  { %845 = vmatmul.msk.f32.gmra.mxu2 %vm320_vm9, %v965_v35  ;;  %853 = vmatmul.msk.f32.gmra.mxu3 %vm320_vm9, %v968_v36 }
 0x280   :  { %v969_v38 = vpop.trf.xlu2 }
 0x281   :  { %v973_v41 = vunpack.i.h.bf16 %v969_v38  ;;  %v970_v42 = vunpack.i.l.bf16 %v969_v38 }
 0x283   :  { %846 = vmatmul.msk.f32.gmra.mxu2 %vm320_vm9, %v970_v42  ;;  %854 = vmatmul.msk.f32.gmra.mxu3 %vm320_vm9, %v973_v41  ;;  %v392_v42 = vld [vmem:[%s1655_s5 + $0x30] sm:$0xff] }
 0x28d   :  { %v976_v31 = vpop.trf.xlu0 }
 0x28e   :  { %v980_v33 = vunpack.i.h.bf16 %v976_v31  ;;  %v977_v34 = vunpack.i.l.bf16 %v976_v31  ;;  %v860_v31 = vld [vmem:[%s1655_s5 + $0x68] sm:$0xff] }
 0x290   :  { %871 = vmatmul.msk.f32.vlgmr.msrb.gmra.mxu0 %vm320_vm9, %v977_v34  ;;  %895 = vmatmul.msk.f32.vlgmr.msrb.gmra.mxu1 %vm320_vm9, %v980_v33  ;;  %v903_v33 = vld [vmem:[%s1655_s5 + $0xc0] sm:$0xff] }
 0x295   :  { %v981_v37 = vpop.trf.xlu0 }
 0x296   :  { %v982_v39 = vunpack.i.l.bf16 %v981_v37  ;;  %v985_v40 = vunpack.i.h.bf16 %v981_v37 }
 0x298   :  { %872 = vmatmul.msk.f32.gmra.mxu0 %vm320_vm9, %v982_v39  ;;  %896 = vmatmul.msk.f32.gmra.mxu1 %vm320_vm9, %v985_v40 }
 0x29d   :  { %v986_v43 = vpop.trf.xlu0 }
 0x29e   :  { %v987_v44 = vunpack.i.l.bf16 %v986_v43  ;;  %v990_v45 = vunpack.i.h.bf16 %v986_v43  ;;  %v880_v43 = vld [vmem:[%s1655_s5 + $0x88] sm:$0xff] }
 0x2a0   :  { %873 = vmatmul.msk.f32.gmra.mxu0 %vm320_vm9, %v987_v44  ;;  %897 = vmatmul.msk.f32.gmra.mxu1 %vm320_vm9, %v990_v45  ;;  %v904_v44 = vld [vmem:[%s1655_s5 + $0xc8] sm:$0xff]  ;;  %v861_v45 = vld [vmem:[%s1655_s5 + $0x70] sm:$0xff] }
 0x2a5   :  { %v991_v46 = vpop.trf.xlu0 }
 0x2a6   :  { %v992_v47 = vunpack.i.l.bf16 %v991_v46  ;;  %v995_v48 = vunpack.i.h.bf16 %v991_v46 }
 0x2a8   :  { %874 = vmatmul.msk.f32.gmra.mxu0 %vm320_vm9, %v992_v47  ;;  %898 = vmatmul.msk.f32.gmra.mxu1 %vm320_vm9, %v995_v48 }
 0x2ad   :  { %v996_v49 = vpop.trf.xlu0 }
 0x2ae   :  { %v997_v50 = vunpack.i.l.bf16 %v996_v49  ;;  %v1000_v51 = vunpack.i.h.bf16 %v996_v49 }
 0x2b0   :  { %v264_v53 = vpop.f32.mrf.mxu2  ;;  %v284_v54 = vpop.f32.mrf.mxu3  ;;  %875 = vmatmul.msk.f32.gmra.mxu0 %vm320_vm9, %v997_v50  ;;  %899 = vmatmul.msk.f32.gmra.mxu1 %vm320_vm9, %v1000_v51 }
 0x2b1   :  { %v285_v55 = vadd.f32 %v284_v54, %v264_v53 }
 0x2b3   :  { %287 = vst [vmem:[#allocation2] sm:$0xff] %v285_v55  ;;  %v393_v55 = vld [vmem:[%s1655_s5 + $0x38] sm:$0xff] }
 0x2b4   :  { %800 = dma.vmem_to_hbm [thread:$0]  %s796_s24, 128, %s798_s27, [#allocation3]  }
 0x2b5   :  { %v1001_v56 = vpop.trf.xlu0 }
 0x2b6   :  { %v1002_v57 = vunpack.i.l.bf16 %v1001_v56  ;;  %v1005_v58 = vunpack.i.h.bf16 %v1001_v56  ;;  %v881_v56 = vld [vmem:[%s1655_s5 + $0x90] sm:$0xff] }
 0x2b8   :  { %876 = vmatmul.msk.f32.gmra.mxu0 %vm320_vm9, %v1002_v57  ;;  %900 = vmatmul.msk.f32.gmra.mxu1 %vm320_vm9, %v1005_v58  ;;  %v905_v57 = vld [vmem:[%s1655_s5 + $0xd0] sm:$0xff]  ;;  %v862_v58 = vld [vmem:[%s1655_s5 + $0x78] sm:$0xff] }
 0x2bd   :  { %v1006_v59 = vpop.trf.xlu0 }
 0x2be   :  { %v1010_v60 = vunpack.i.h.bf16 %v1006_v59  ;;  %v1007_v61 = vunpack.i.l.bf16 %v1006_v59 }
 0x2c0   :  { %877 = vmatmul.msk.f32.vlgmr.msra.gmra.mxu2 %vm320_vm9, %v1007_v61  ;;  %901 = vmatmul.msk.f32.vlgmr.msra.gmra.mxu3 %vm320_vm9, %v1010_v60 }
 0x2c5   :  { %v1011_v62 = vpop.trf.xlu0 }
 0x2c6   :  { %v1015_v63 = vunpack.i.h.bf16 %v1011_v62  ;;  %v1012_v0 = vunpack.i.l.bf16 %v1011_v62 }
 0x2c8   :  { %878 = vmatmul.msk.f32.gmra.mxu2 %vm320_vm9, %v1012_v0  ;;  %902 = vmatmul.msk.f32.gmra.mxu3 %vm320_vm9, %v1015_v63 }
 0x2ce   :  { %v362_v3 = vpop.f32.mrf.mxu2  ;;  %v488_v4 = vpop.f32.mrf.mxu3 }
 0x2cf   :  { %v394_v5 = vadd.f32 %v386_v1, %v362_v3  ;;  %v521_v52 = vadd.f32 %v855_v2, %v488_v4  ;;  %v882_v3 = vld [vmem:[%s1655_s5 + $0x98] sm:$0xff] }
 0x2d0   :  { %v906_v4 = vld [vmem:[%s1655_s5 + $0xd8] sm:$0xff] }
 0x2d1   :  { %403 = vst.msk [vmem:[%s1655_s5] sm:$0xff] %vm42_vm10, %v394_v5 }
 0x2d2   :  { %863 = vst.msk [vmem:[%s1655_s5 + $0x40] sm:$0xff] %vm42_vm10, %v521_v52 }
 0x2d6   :  { %v365_v8 = vpop.f32.mrf.mxu2  ;;  %v491_v9 = vpop.f32.mrf.mxu3 }
 0x2d7   :  { %v395_v10 = vadd.f32 %v387_v6, %v365_v8  ;;  %v522_v11 = vadd.f32 %v856_v7, %v491_v9  ;;  %v883_v8 = vld [vmem:[%s1655_s5 + $0xa0] sm:$0xff] }
 0x2d8   :  { %v907_v9 = vld [vmem:[%s1655_s5 + $0xe0] sm:$0xff] }
 0x2d9   :  { %404 = vst.msk [vmem:[%s1655_s5 + $0x8] sm:$0xff] %vm42_vm10, %v395_v10 }
 0x2da   :  { %864 = vst.msk [vmem:[%s1655_s5 + $0x48] sm:$0xff] %vm42_vm10, %v522_v11 }
 0x2de   :  { %v368_v14 = vpop.f32.mrf.mxu2  ;;  %v494_v15 = vpop.f32.mrf.mxu3 }
 0x2df   :  { %v396_v16 = vadd.f32 %v388_v12, %v368_v14  ;;  %v523_v17 = vadd.f32 %v857_v13, %v494_v15  ;;  %v884_v14 = vld [vmem:[%s1655_s5 + $0xa8] sm:$0xff] }
 0x2e0   :  { %v908_v15 = vld [vmem:[%s1655_s5 + $0xe8] sm:$0xff] }
 0x2e1   :  { %405 = vst.msk [vmem:[%s1655_s5 + $0x10] sm:$0xff] %vm42_vm10, %v396_v16 }
 0x2e2   :  { %865 = vst.msk [vmem:[%s1655_s5 + $0x50] sm:$0xff] %vm42_vm10, %v523_v17 }
 0x2e6   :  { %v371_v20 = vpop.f32.mrf.mxu2  ;;  %v497_v21 = vpop.f32.mrf.mxu3 }
 0x2e7   :  { %v397_v22 = vadd.f32 %v389_v18, %v371_v20  ;;  %v524_v23 = vadd.f32 %v858_v19, %v497_v21  ;;  %v885_v20 = vld [vmem:[%s1655_s5 + $0xb0] sm:$0xff] }
 0x2e8   :  { %v909_v21 = vld [vmem:[%s1655_s5 + $0xf0] sm:$0xff] }
 0x2e9   :  { %406 = vst.msk [vmem:[%s1655_s5 + $0x18] sm:$0xff] %vm42_vm10, %v397_v22 }
 0x2ea   :  { %866 = vst.msk [vmem:[%s1655_s5 + $0x58] sm:$0xff] %vm42_vm10, %v524_v23 }
 0x2ee   :  { %v374_v26 = vpop.f32.mrf.mxu2  ;;  %v500_v27 = vpop.f32.mrf.mxu3 }
 0x2ef   :  { %v398_v28 = vadd.f32 %v390_v24, %v374_v26  ;;  %v525_v29 = vadd.f32 %v859_v25, %v500_v27  ;;  %v886_v26 = vld [vmem:[%s1655_s5 + $0xb8] sm:$0xff] }
 0x2f0   :  { %v910_v27 = vld [vmem:[%s1655_s5 + $0xf8] sm:$0xff] }
 0x2f1   :  { %407 = vst.msk [vmem:[%s1655_s5 + $0x20] sm:$0xff] %vm42_vm10, %v398_v28 }
 0x2f2   :  { %867 = vst.msk [vmem:[%s1655_s5 + $0x60] sm:$0xff] %vm42_vm10, %v525_v29 }
 0x2f6   :  { %v377_v34 = vpop.f32.mrf.mxu2  ;;  %v503_v35 = vpop.f32.mrf.mxu3 }
 0x2f7   :  { %v399_v36 = vadd.f32 %v391_v30, %v377_v34  ;;  %v526_v37 = vadd.f32 %v860_v31, %v503_v35 }
 0x2f9   :  { %408 = vst.msk [vmem:[%s1655_s5 + $0x28] sm:$0xff] %vm42_vm10, %v399_v36 }
 0x2fa   :  { %868 = vst.msk [vmem:[%s1655_s5 + $0x68] sm:$0xff] %vm42_vm10, %v526_v37 }
 0x2fe   :  { %v380_v46 = vpop.f32.mrf.mxu2  ;;  %v506_v47 = vpop.f32.mrf.mxu3 }
 0x2ff   :  { %v400_v50 = vadd.f32 %v392_v42, %v380_v46  ;;  %v527_v54 = vadd.f32 %v861_v45, %v506_v47 }
 0x301   :  { %409 = vst.msk [vmem:[%s1655_s5 + $0x30] sm:$0xff] %vm42_vm10, %v400_v50 }
 0x302   :  { %869 = vst.msk [vmem:[%s1655_s5 + $0x70] sm:$0xff] %vm42_vm10, %v527_v54 }
 0x306   :  { %v383_v59 = vpop.f32.mrf.mxu2  ;;  %v509_v60 = vpop.f32.mrf.mxu3 }
 0x307   :  { %v401_v63 = vadd.f32 %v393_v55, %v383_v59  ;;  %v528_v2 = vadd.f32 %v862_v58, %v509_v60 }
 0x309   :  { %410 = vst.msk [vmem:[%s1655_s5 + $0x38] sm:$0xff] %vm42_vm10, %v401_v63 }
 0x30a   :  { %870 = vst.msk [vmem:[%s1655_s5 + $0x78] sm:$0xff] %vm42_vm10, %v528_v2 }
 0x30d   :  { %v613_v38 = vpop.f32.mrf.mxu0  ;;  %v738_v39 = vpop.f32.mrf.mxu1 }
 0x30e   :  { %v646_v40 = vadd.f32 %v879_v32, %v613_v38  ;;  %v771_v41 = vadd.f32 %v903_v33, %v738_v39 }
 0x310   :  { %887 = vst.msk [vmem:[%s1655_s5 + $0x80] sm:$0xff] %vm42_vm10, %v646_v40 }
 0x311   :  { %911 = vst.msk [vmem:[%s1655_s5 + $0xc0] sm:$0xff] %vm42_vm10, %v771_v41 }
 0x315   :  { %v616_v48 = vpop.f32.mrf.mxu0  ;;  %v741_v49 = vpop.f32.mrf.mxu1 }
 0x316   :  { %v647_v51 = vadd.f32 %v880_v43, %v616_v48  ;;  %v772_v53 = vadd.f32 %v904_v44, %v741_v49 }
 0x318   :  { %888 = vst.msk [vmem:[%s1655_s5 + $0x88] sm:$0xff] %vm42_vm10, %v647_v51 }
 0x319   :  { %912 = vst.msk [vmem:[%s1655_s5 + $0xc8] sm:$0xff] %vm42_vm10, %v772_v53 }
 0x31d   :  { %v619_v61 = vpop.f32.mrf.mxu0  ;;  %v744_v62 = vpop.f32.mrf.mxu1 }
 0x31e   :  { %v648_v0 = vadd.f32 %v881_v56, %v619_v61  ;;  %v773_v1 = vadd.f32 %v905_v57, %v744_v62 }
 0x320   :  { %889 = vst.msk [vmem:[%s1655_s5 + $0x90] sm:$0xff] %vm42_vm10, %v648_v0 }
 0x321   :  { %913 = vst.msk [vmem:[%s1655_s5 + $0xd0] sm:$0xff] %vm42_vm10, %v773_v1 }
 0x325   :  { %v622_v5 = vpop.f32.mrf.mxu0  ;;  %v747_v52 = vpop.f32.mrf.mxu1 }
 0x326   :  { %v649_v6 = vadd.f32 %v882_v3, %v622_v5  ;;  %v774_v7 = vadd.f32 %v906_v4, %v747_v52 }
 0x328   :  { %890 = vst.msk [vmem:[%s1655_s5 + $0x98] sm:$0xff] %vm42_vm10, %v649_v6 }
 0x329   :  { %914 = vst.msk [vmem:[%s1655_s5 + $0xd8] sm:$0xff] %vm42_vm10, %v774_v7 }
 0x32d   :  { %v625_v10 = vpop.f32.mrf.mxu0  ;;  %v750_v11 = vpop.f32.mrf.mxu1 }
 0x32e   :  { %v650_v12 = vadd.f32 %v883_v8, %v625_v10  ;;  %v775_v13 = vadd.f32 %v907_v9, %v750_v11 }
 0x330   :  { %891 = vst.msk [vmem:[%s1655_s5 + $0xa0] sm:$0xff] %vm42_vm10, %v650_v12 }
 0x331   :  { %915 = vst.msk [vmem:[%s1655_s5 + $0xe0] sm:$0xff] %vm42_vm10, %v775_v13 }
 0x335   :  { %v628_v16 = vpop.f32.mrf.mxu0  ;;  %v753_v17 = vpop.f32.mrf.mxu1 }
 0x336   :  { %v651_v18 = vadd.f32 %v884_v14, %v628_v16  ;;  %v776_v19 = vadd.f32 %v908_v15, %v753_v17 }
 0x338   :  { %892 = vst.msk [vmem:[%s1655_s5 + $0xa8] sm:$0xff] %vm42_vm10, %v651_v18 }
 0x339   :  { %916 = vst.msk [vmem:[%s1655_s5 + $0xe8] sm:$0xff] %vm42_vm10, %v776_v19 }
 0x343   :  { %v631_v22 = vpop.f32.mrf.mxu2  ;;  %v756_v23 = vpop.f32.mrf.mxu3 }
 0x344   :  { %v652_v24 = vadd.f32 %v885_v20, %v631_v22  ;;  %v777_v25 = vadd.f32 %v909_v21, %v756_v23 }
 0x346   :  { %893 = vst.msk [vmem:[%s1655_s5 + $0xb0] sm:$0xff] %vm42_vm10, %v652_v24 }
 0x347   :  { %917 = vst.msk [vmem:[%s1655_s5 + $0xf0] sm:$0xff] %vm42_vm10, %v777_v25 }
 0x34b   :  { %v634_v28 = vpop.f32.mrf.mxu2  ;;  %v759_v29 = vpop.f32.mrf.mxu3 }
 0x34c   :  { %v653_v30 = vadd.f32 %v886_v26, %v634_v28  ;;  %v778_v31 = vadd.f32 %v910_v27, %v759_v29 }
 0x34e   :  { %894 = vst.msk [vmem:[%s1655_s5 + $0xb8] sm:$0xff] %vm42_vm10, %v653_v30 }
 0x34f   :  { %918 = vst.msk [vmem:[%s1655_s5 + $0xf8] sm:$0xff] %vm42_vm10, %v778_v31 }
 0x350   :  { %1064 = dma.done.wait [#allocation3], 128  }
 0x351   :  { %1065 = vsyncadd [#allocation3], 4294967168 }
 0x352   :  { %1066 = dma.done.wait [#allocation5], 64  }
 0x353   :  { %1067 = vsyncadd [#allocation5], 4294967232 }
 0x354   :  { %827 = vsyncpa [#allocation3], 1 }
 0x355   :  { %828 = vsyncpa [#allocation5], 1 }

</bundles_post_ra>
